<compile_context>
chip_gen: v5e
topology: v5e:2x2
jax: 0.10.0
libtpu: 0.0.40
codegen_flags: <defaults>
</compile_context>

<pallas_src>
import math

import jax
import jax.numpy as jnp
from jax.experimental import pallas as pl
from jax.experimental.pallas import tpu as pltpu


def _gelu_tanh(x):
    # HF "gelu_new": 0.5 * x * (1 + tanh(sqrt(2/pi) * (x + 0.044715 * x**3)))
    c = math.sqrt(2.0 / math.pi)
    return 0.5 * x * (1.0 + jnp.tanh(c * (x + 0.044715 * x * x * x)))


def _round_up(n, m):
    return ((n + m - 1) // m) * m


def _cdiv(a, b):
    return (a + b - 1) // b


# ---------------------------------------------------------------------------
# Kernel
# ---------------------------------------------------------------------------
def mlp_block_kernel(x_ref, w1_ref, b1_ref, w2_ref, b2_ref, o_ref):
    # x_ref: (TM, Hp)   w*_ref: (Hp, Hp)   b*_ref: (1, Hp)   o_ref: (TM, Hp)
    x = x_ref[...]

    # ff1: native-dtype MXU matmul with f32 accumulation, bias add in f32.
    h = jnp.dot(x, w1_ref[...], preferred_element_type=jnp.float32)
    h = h + b1_ref[...].astype(jnp.float32)

    # activation on the f32 accumulator (VPU/EUP).
    h = _gelu_tanh(h)

    # ff2: cast intermediate back to the weight dtype so the MXU runs at
    # native (bf16) rate when the model is bf16; no-op for f32.
    y = jnp.dot(h.astype(w2_ref.dtype), w2_ref[...],
                preferred_element_type=jnp.float32)
    y = y + b2_ref[...].astype(jnp.float32)

    # TODO(synk): training-mode dropout (pdrop) omitted — eval/inference semantics (identity).
    o_ref[...] = y.astype(o_ref.dtype)


# ---------------------------------------------------------------------------
# Parameter packing (done ONCE at setup time, reused across forward calls)
# ---------------------------------------------------------------------------
def pack_mlp_params(w1, b1, w2, b2, *, lanes=128):
    """w1, w2: (H, H) pre-transposed for x @ W; b1, b2: (H,)."""
    H = w1.shape[0]
    if H < lanes and lanes % H == 0:
        P = lanes // H
    else:
        P = 1
    Hp = H * P
    if P > 1:
        # Block-diagonal replication so packed lane-groups stay independent.
        w1p = jnp.kron(jnp.eye(P, dtype=w1.dtype), w1)          # (Hp, Hp)
        w2p = jnp.kron(jnp.eye(P, dtype=w2.dtype), w2)          # (Hp, Hp)
        b1p = jnp.tile(b1, P).reshape(1, Hp)
        b2p = jnp.tile(b2, P).reshape(1, Hp)
    else:
        w1p, w2p = w1, w2
        b1p, b2p = b1.reshape(1, Hp), b2.reshape(1, Hp)
    return {"w1": w1p, "b1": b1p, "w2": w2p, "b2": b2p,
            "H": H, "P": P, "Hp": Hp}


# ---------------------------------------------------------------------------
# Tile selection
# ---------------------------------------------------------------------------
def _choose_tm(Mp, quantum, tm_max):
    tm_max = max(quantum, (tm_max // quantum) * quantum)
    # Cap so the grid has >= 2 steps: enables DMA pipelining everywhere and
    # lets dimension_semantics=("parallel",) use both v7x TensorCores.
    hi = max(quantum, min(tm_max, _round_up(_cdiv(Mp, 2), quantum)))
    # Prefer a tile that divides Mp exactly (no wrapper-side pad / slice
    # copies of the activations), unless it would shrink the tile too much.
    best = None
    for tm in range(hi, quantum - 1, -quantum):
        if Mp % tm == 0:
            best = tm
            break
    if best is not None and best * 4 >= hi:
        return best
    return hi


# ---------------------------------------------------------------------------
# Forward
# ---------------------------------------------------------------------------
def _mlp_forward_f32(x2d, w1, b1, w2, b2):
    h = jnp.dot(x2d.astype(jnp.float32), w1.astype(jnp.float32)) + b1.astype(jnp.float32)
    h = _gelu_tanh(h)
    return jnp.dot(h, w2.astype(jnp.float32)) + b2.astype(jnp.float32)


def _mlp_block_xla(x, params):
    # Fused XLA fallback for tiny M where pallas_call launch overhead dominates.
    H = params["H"]
    w1 = params["w1"][:H, :H]
    w2 = params["w2"][:H, :H]
    b1 = params["b1"][0, :H]
    b2 = params["b2"][0, :H]
    B, S, _ = x.shape
    y = _mlp_forward_f32(x.reshape(-1, H), w1, b1, w2, b2)
    return y.reshape(B, S, H).astype(x.dtype)


def mlp_block(x, params, *, tm_max=1024, compute_dtype=None):
    """x: (B, S, H); params: output of pack_mlp_params().

    compute_dtype (optional, e.g. jnp.bfloat16): stream x and run the two MXU
    matmuls in that dtype (f32 accumulation / bias / GELU kept).  Big win on
    v5e (MXU rate) and halves streamed activation bytes on v6e/v7x; off by
    default so f32 numerics match the reference.
    """
    B, S, H = x.shape
    assert H == params["H"], "parameter / activation h_dim mismatch"
    P, Hp = params["P"], params["Hp"]
    out_dtype = x.dtype
    M = B * S

    # Sublane quantum for the streamed dtype (8 f32 / 16 bf16 / 32 int8-fp8).
    act_dtype = jnp.dtype(compute_dtype) if compute_dtype is not None else jnp.dtype(x.dtype)
    quantum = {4: 8, 2: 16, 1: 32}.get(act_dtype.itemsize, 8)

    # Packed-row count (lane-dense packing of P consecutive rows).
    Mp = _cdiv(M, P)

    # Tiny problems: launch-overhead dominated -> fused XLA path.
    if Mp < 2 * quantum:
        return _mlp_block_xla(x, params)

    tm = _choose_tm(Mp, quantum, tm_max)
    Mp_pad = _round_up(Mp, tm)
    M_pad = Mp_pad * P

    x2d = x.reshape(M, H)
    if compute_dtype is not None:
        x2d = x2d.astype(compute_dtype)
    if M_pad != M:
        # Rare (only for awkward M); typical shapes pick an exact-divisor tile.
        x2d = jnp.pad(x2d, ((0, M_pad - M), (0, 0)))
    # (M_pad, H) and (Mp_pad, Hp) share the same row-major byte layout: free.
    xp = x2d.reshape(Mp_pad, Hp)

    w1p, b1p, w2p, b2p = params["w1"], params["b1"], params["w2"], params["b2"]
    if compute_dtype is not None:
        w1p = w1p.astype(compute_dtype)
        w2p = w2p.astype(compute_dtype)

    grid = (Mp_pad // tm,)

    outp = pl.pallas_call(
        mlp_block_kernel,
        out_shape=jax.ShapeDtypeStruct((Mp_pad, Hp), out_dtype),
        grid=grid,
        in_specs=[
            pl.BlockSpec((tm, Hp), lambda i: (i, 0)),   # x tiles stream / pipeline
            pl.BlockSpec((Hp, Hp), lambda i: (0, 0)),   # W1 resident in VMEM
            pl.BlockSpec((1, Hp), lambda i: (0, 0)),    # b1 resident
            pl.BlockSpec((Hp, Hp), lambda i: (0, 0)),   # W2 resident
            pl.BlockSpec((1, Hp), lambda i: (0, 0)),    # b2 resident
        ],
        out_specs=pl.BlockSpec((tm, Hp), lambda i: (i, 0)),
        compiler_params=pltpu.CompilerParams(
            dimension_semantics=("parallel",)),
    )(xp, w1p, b1p, w2p, b2p)

    out2d = outp.reshape(M_pad, H)
    if M_pad != M:
        out2d = out2d[:M]
    return out2d.reshape(B, S, H)


# ---------------------------------------------------------------------------
# Reference
# ---------------------------------------------------------------------------
def reference_mlp_block(x, w1, b1, w2, b2):
    B, S, H = x.shape
    y = _mlp_forward_f32(x.reshape(-1, H), w1, b1, w2, b2)
    return y.reshape(B, S, H).astype(x.dtype)


if __name__ == "__main__":
    key = jax.random.PRNGKey(0)
    kx, kw1, kb1, kw2, kb2, kx2 = jax.random.split(key, 6)

    H = 32
    bound = 1.0 / math.sqrt(H)
    # Deterministic parameter init (nn.Linear shapes; pre-transposed for x @ W).
    w1 = jax.random.uniform(kw1, (H, H), jnp.float32, -bound, bound)
    b1 = jax.random.uniform(kb1, (H,), jnp.float32, -bound, bound)
    w2 = jax.random.uniform(kw2, (H, H), jnp.float32, -bound, bound)
    b2 = jax.random.uniform(kb2, (H,), jnp.float32, -bound, bound)

    params = pack_mlp_params(w1, b1, w2, b2)

    # 1) Small shape consistent with the module (batch=2, seq=8, h_dim=32).
    #    Tiny-M regime -> fused XLA fallback path.
    x_small = jax.random.normal(kx, (2, 8, H), dtype=jnp.float32)
    out_small = jax.block_until_ready(mlp_block(x_small, params))
    ref_small = reference_mlp_block(x_small, w1, b1, w2, b2)
    assert out_small.shape == x_small.shape
    assert jnp.allclose(out_small, ref_small, atol=1e-5, rtol=1e-5)

    # 2) Larger shape exercising the Pallas kernel itself: multi-step parallel
    #    grid (Mp=512 packed rows, tm=256 -> 2 steps), lane-dense packing,
    #    resident weights, no padding / slicing copies.
    x_big = jax.random.normal(kx2, (4, 512, H), dtype=jnp.float32)
    out_big = jax.block_until_ready(mlp_block(x_big, params))
    ref_big = reference_mlp_block(x_big, w1, b1, w2, b2)
    assert out_big.shape == x_big.shape
    assert jnp.allclose(out_big, ref_big, atol=1e-5, rtol=1e-5)

    print("KERNEL_OK")
</pallas_src>

<mosaic_0001>
module attributes {stable_mosaic.version = 11 : i64} {
  func.func @mlp_block_kernel(%arg0: i32, %arg1: memref<256x128xf32, #tpu.memory_space<vmem>>, %arg2: memref<128x128xf32, #tpu.memory_space<vmem>>, %arg3: memref<1x128xf32, #tpu.memory_space<vmem>>, %arg4: memref<128x128xf32, #tpu.memory_space<vmem>>, %arg5: memref<1x128xf32, #tpu.memory_space<vmem>>, %arg6: memref<256x128xf32, #tpu.memory_space<vmem>>) attributes {dimension_semantics = [#tpu.dimension_semantics<parallel>], iteration_bounds = array<i64: 2>, scalar_prefetch = 0 : i64, scratch_operands = 0 : i64, tpu.core_type = #tpu.core_type<tc>, window_params = [{transform_indices = @transform_0, window_bounds = array<i64: 256, 128>}, {pipeline_mode = #tpu.pipeline_mode<synchronous>, transform_indices = @transform_1, window_bounds = array<i64: 128, 128>}, {pipeline_mode = #tpu.pipeline_mode<synchronous>, transform_indices = @transform_2, window_bounds = array<i64: 1, 128>}, {pipeline_mode = #tpu.pipeline_mode<synchronous>, transform_indices = @transform_3, window_bounds = array<i64: 128, 128>}, {pipeline_mode = #tpu.pipeline_mode<synchronous>, transform_indices = @transform_4, window_bounds = array<i64: 1, 128>}, {transform_indices = @transform_5, window_bounds = array<i64: 256, 128>}]} {
    %c0 = arith.constant 0 : index
    %c0_0 = arith.constant 0 : index
    %0 = vector.load %arg1[%c0, %c0_0] : memref<256x128xf32, #tpu.memory_space<vmem>>, vector<256x128xf32>
    %c0_1 = arith.constant 0 : index
    %c0_2 = arith.constant 0 : index
    %1 = vector.load %arg2[%c0_1, %c0_2] : memref<128x128xf32, #tpu.memory_space<vmem>>, vector<128x128xf32>
    %cst = arith.constant dense<0.000000e+00> : vector<256x128xf32>
    %2 = tpu.matmul %0, %1, %cst {dimension_numbers = #tpu.dot_dimension_numbers<[1], [0], [0], [1], [0, 0, 1, 1], [], []>} : vector<256x128xf32>, vector<128x128xf32>, vector<256x128xf32> -> vector<256x128xf32>
    %c0_3 = arith.constant 0 : index
    %c0_4 = arith.constant 0 : index
    %3 = vector.load %arg3[%c0_3, %c0_4] : memref<1x128xf32, #tpu.memory_space<vmem>>, vector<1x128xf32>
    %4 = vector.broadcast %3 : vector<1x128xf32> to vector<256x128xf32>
    %5 = arith.addf %2, %4 : vector<256x128xf32>
    %cst_5 = arith.constant 5.000000e-01 : f32
    %6 = vector.broadcast %cst_5 : f32 to vector<256x128xf32>
    %7 = arith.mulf %6, %5 : vector<256x128xf32>
    %cst_6 = arith.constant 4.471500e-02 : f32
    %8 = vector.broadcast %cst_6 : f32 to vector<256x128xf32>
    %9 = arith.mulf %8, %5 : vector<256x128xf32>
    %10 = arith.mulf %9, %5 : vector<256x128xf32>
    %11 = arith.mulf %10, %5 : vector<256x128xf32>
    %12 = arith.addf %5, %11 : vector<256x128xf32>
    %cst_7 = arith.constant 0.797884583 : f32
    %13 = vector.broadcast %cst_7 : f32 to vector<256x128xf32>
    %14 = arith.mulf %13, %12 : vector<256x128xf32>
    %15 = math.tanh %14 : vector<256x128xf32>
    %cst_8 = arith.constant 1.000000e+00 : f32
    %16 = vector.broadcast %cst_8 : f32 to vector<256x128xf32>
    %17 = arith.addf %16, %15 : vector<256x128xf32>
    %18 = arith.mulf %7, %17 : vector<256x128xf32>
    %c0_9 = arith.constant 0 : index
    %c0_10 = arith.constant 0 : index
    %19 = vector.load %arg4[%c0_9, %c0_10] : memref<128x128xf32, #tpu.memory_space<vmem>>, vector<128x128xf32>
    %cst_11 = arith.constant dense<0.000000e+00> : vector<256x128xf32>
    %20 = tpu.matmul %18, %19, %cst_11 {dimension_numbers = #tpu.dot_dimension_numbers<[1], [0], [0], [1], [0, 0, 1, 1], [], []>} : vector<256x128xf32>, vector<128x128xf32>, vector<256x128xf32> -> vector<256x128xf32>
    %c0_12 = arith.constant 0 : index
    %c0_13 = arith.constant 0 : index
    %21 = vector.load %arg5[%c0_12, %c0_13] : memref<1x128xf32, #tpu.memory_space<vmem>>, vector<1x128xf32>
    %22 = vector.broadcast %21 : vector<1x128xf32> to vector<256x128xf32>
    %23 = arith.addf %20, %22 : vector<256x128xf32>
    %c0_14 = arith.constant 0 : index
    %c0_15 = arith.constant 0 : index
    %24 = vector.load %arg6[%c0_14, %c0_15] : memref<256x128xf32, #tpu.memory_space<vmem>>, vector<256x128xf32>
    tpu.vector_store %arg6[%c0_14, %c0_15], %23 {strides = array<i32>} : memref<256x128xf32, #tpu.memory_space<vmem>>, vector<256x128xf32>,
    return
  }
  func.func @transform_0(%arg0: i32) -> (i32, i32) {
    %c0_i32 = arith.constant 0 : i32
    %c0_i32_0 = arith.constant 0 : i32
    return %arg0, %c0_i32 : i32, i32
  }
  func.func @transform_1(%arg0: i32) -> (i32, i32) {
    %c0_i32 = arith.constant 0 : i32
    %c0_i32_0 = arith.constant 0 : i32
    %c0_i32_1 = arith.constant 0 : i32
    return %c0_i32, %c0_i32_0 : i32, i32
  }
  func.func @transform_2(%arg0: i32) -> (i32, i32) {
    %c0_i32 = arith.constant 0 : i32
    %c0_i32_0 = arith.constant 0 : i32
    %c0_i32_1 = arith.constant 0 : i32
    return %c0_i32, %c0_i32_0 : i32, i32
  }
  func.func @transform_3(%arg0: i32) -> (i32, i32) {
    %c0_i32 = arith.constant 0 : i32
    %c0_i32_0 = arith.constant 0 : i32
    %c0_i32_1 = arith.constant 0 : i32
    return %c0_i32, %c0_i32_0 : i32, i32
  }
  func.func @transform_4(%arg0: i32) -> (i32, i32) {
    %c0_i32 = arith.constant 0 : i32
    %c0_i32_0 = arith.constant 0 : i32
    %c0_i32_1 = arith.constant 0 : i32
    return %c0_i32, %c0_i32_0 : i32, i32
  }
  func.func @transform_5(%arg0: i32) -> (i32, i32) {
    %c0_i32 = arith.constant 0 : i32
    %c0_i32_0 = arith.constant 0 : i32
    return %arg0, %c0_i32 : i32, i32
  }
}

</mosaic_0001>

<bundles_post_ra>
// kernel: tpu_custom_call.1
= control target key start
LH: loop header
LB: loop body
LE: loop exit
PB: predicated region body
PF: predicated region fallthrough
CT: control target
= control target key end

     0   :  { %10 = vsyncpa [#allocation3], 0  ;;  %s1725_s0 = inlined_call_operand.hbm [shape: f32[512,128], index: 0, kind: input, shape index: {}]   ;;  %s1726_s1 = inlined_call_operand.hbm [shape: f32[128,128], index: 1, kind: input, shape index: {}]   ;;  %s1727_s2 = inlined_call_operand.vmem [shape: f32[1,128], index: 2, kind: input, shape index: {}]   ;;  %s1728_s3 = inlined_call_operand.hbm [shape: f32[128,128], index: 3, kind: input, shape index: {}]   ;;  %s1729_s4 = inlined_call_operand.vmem [shape: f32[1,128], index: 4, kind: input, shape index: {}]   ;;  %s1730_s5 = inlined_call_operand.hbm [shape: f32[512,128], index: 5, kind: output, shape index: {}]  }
   0x1   :  { %12 = vsyncpa [#allocation3 + $0x1], 0 }
   0x2   :  { %13 = vsyncpa [#allocation6], 0 }
   0x3   :  { %14 = vsyncpa [#allocation4], 0 }
   0x4   :  { %16 = vsyncpa [#allocation4 + $0x1], 0  ;;  %s1393_s18 = smov 0   ;;  %s1395_s19 = smov 0  }
   0x5   :  { %s1397_s20 = smov 0   ;;  %s1399_s21 = smov 0  }
   0x6 LB: > { %s1414_s22 = sadd.s32 4294967295, %s1355_s21   ;;  %s1006_s23 = sadd.s32 4294967294, %s1355_s21   ;;  %s1355_s21 = sphi %s1399_s21, %s1742_s21   ;;  %s1351_s20 = sphi %s1397_s20, %s1741_s20   ;;  %s1347_s19 = sphi %s1395_s19, %s1740_s19   ;;  %s1343_s18 = sphi %s1393_s18, %s1739_s18  }
   0x7   : > { %p42_p0 = scmp.ne.s32.totalorder %s1347_s19, %s1343_s18  ;;  %p43_p1 = scmp.eq.s32.totalorder %s1414_s22, 0 }
   0x8   : > { %p150_p2 = scmp.eq.s32.totalorder %s1414_s22, 1  ;;  %p156_p3 = scmp.eq.s32.totalorder %s1006_s23, 1 }
   0x9   : > { %p1423_p4 = por %p43_p1, %p42_p0  ;;  %p1007_p5 = scmp.ge.s32.totalorder %s1355_s21, 1 }
   0xa   : > { %p1428_p6 = por %p156_p3, %p42_p0  ;;  %p163_p7 = scmp.lt.s32.totalorder %s1355_s21, 3 }
   0xb   : > { %s174_s28 = sshll.u32 %s1726_s1, 4  ;;  %s1357_s30 = smov [#allocation5]   ;;  %s175_s28 = int_to_ptr.hbm [resolvable:$true] %s174_s28 }
   0xc   : > { %p1436_p8 = pnand %p1007_p5, %p163_p7  ;;  %s176_s6 = sshll.u32 %s1357_s30, 4  ;;  %s177_s6 = int_to_ptr.vmem [resolvable:$true] %s176_s6 }
   0xd   : > { %s191_s9 = sshll.u32 %s1728_s3, 4  ;;  %s1731_s10 = smov 128   ;;  %s192_s9 = int_to_ptr.hbm [resolvable:$true] %s191_s9 }
   0xe   : > { %p1070_p9 = pneg %p1436_p8  ;;  %s1359_s11 = smov 8  }
   0xf   : > { %s1360_s12 = smov [#allocation7]   ;;  %s1455_s14 = sadd.s32 1, %s1355_s21  }
  0x10   : > { %p1071_p10 = pnand %p1070_p9, %p43_p1  ;;  %s193_s13 = sshll.u32 %s1360_s12, 4  ;;  %s194_s13 = int_to_ptr.vmem [resolvable:$true] %s193_s13 }
  0x11   : > { %s29_s15 = sadd.s32 1, %s1351_s20  ;;  %s26_s16 = ssub.s32 %s1355_s21, %s1455_s14 }
  0x12   : > { %1073 = dma.hbm_to_vmem [thread:$0]  (!%p1071_p10), %s175_s28, 2048, %s177_s6, [#allocation6], %s1731_s10, %s1731_s10, %s1359_s11  }
  0x13   : > { %1076 = dma.hbm_to_vmem [thread:$0]  (!%p1071_p10), %s192_s9, 2048, %s194_s13, [#allocation6], %s1731_s10, %s1731_s10, %s1359_s11  }
  0x14   : > { %p36_p12 = scmp.ne.s32.totalorder %s1351_s20, %s1347_s19  ;;  %p27_p13 = scmp.eq.s32.totalorder %s26_s16, 0 }
  0x15   : > { %p37_p0 = scmp.eq.s32.totalorder %s1355_s21, 0  ;;  %p1087_p5 = scmp.lt.s32.totalorder %s1355_s21, 2 }
  0x16   : > { %p1465_p3 = por %p150_p2, %p36_p12  ;;  %s210_s26 = sand.u32 1, %s1351_s20  }
  0x17   : > { %s1471_s23 = scalar_select %p27_p13, %s1351_s20, %s29_s15  }
  0x18   : > { %p38_p7 = por %p37_p0, %p36_p12  ;;  %s1011_s27 = sshll.u32 %s210_s26, 8 }
  0x19   : > { %s1024_s28 = sshll.u32 %s1355_s21, 8  ;;  %s214_s8 = scalar_lea.vmem [#allocation2], %s1011_s27 }
  0x1a   : > { %s219_s7 = scalar_lea.hbm %s1725_s0, %s1024_s28  ;;  %s222_s9 = sshll.u32 %s214_s8, 4  ;;  %s223_s9 = int_to_ptr.vmem [resolvable:$true] %s222_s9 }
  0x1b   : > { %s220_s12 = sshll.u32 %s219_s7, 4  ;;  %p1478_p2 = pnand %p1087_p5, %p38_p7  ;;  %s221_s12 = int_to_ptr.hbm [resolvable:$true] %s220_s12 }
  0x1c   : > { %s211_s15 = scalar_lea.sflag [#allocation3], %s210_s26  ;;  %s1255_s16 = sshra.s32 %s221_s12, 4  ;;  %s1256_s16 = int_to_ptr.hbm [resolvable:$true] %s1255_s16 }
  0x1d   : > { %s1257_s10 = scalar_lea.hbm %s1256_s16, 256  ;;  %p1259_p10 = pneg %p1478_p2 }
  0x1e   : > { %p1258_p9 = scmp.ne.s32.totalorder %s1256_s16, %s1257_s10  ;;  %s1262_s30 = scalar_lea.hbm %s1725_s0, 512 }
  0x1f   : > { %p1263_p0 = scmp.lt.s32.totalorder %s1256_s16, %s1725_s0  ;;  %p1264_p5 = scmp.lt.s32.totalorder %s1262_s30, %s1257_s10 }
  0x20   : > { %p1260_p12 = pnand %p1259_p10, %p1258_p9 }
  0x21   : > { %p1265_p7 = por %p1264_p5, %p1263_p0 }
  0x22   : > { %p1261_p13 = pneg %p1260_p12 }
  0x24   : > { %p1266_p11 = pnand %p1265_p7, %p1261_p13 }
  0x26   : > { %1269 = shalt.err (!%p1266_p11)
}
  0x27   : > { %s1737_s26 = smov 128   ;;  %234 = sbr.rel (%p1436_p8) target bundleno = 492 (0x1ec), region = 40 }
  0x28   : > { %1080 = dma.hbm_to_vmem [thread:$0]  (!%p1478_p2), %s221_s12, 4096, %s223_s9, %s211_s15, %s1737_s26, %s1737_s26, %s1359_s11  }
  0x29   : > { %s1498_s8 = sand.u32 (!%p1436_p8), 1, %s1347_s19  }
  0x2a   : > { %s1015_s10 = sshll.u32 (!%p1436_p8), %s1498_s8, 8  ;;  %s237_s16 = scalar_lea.sflag (!%p1436_p8), [#allocation3], %s1498_s8 }
  0x2b   : > { %s1504_s28 = scalar_lea.vmem (!%p1436_p8), [#allocation2], %s1015_s10 }
  0x2c   : > { %1330 = dma.done.wait (%p1423_p4), %s237_s16, 4096  }
  0x2d   : > { %1332 = vsyncadd (%p1423_p4), %s237_s16, 4294963200 }
  0x2e   : > { %1334 = dma.done.wait (%p43_p1), [#allocation6], 4096  }
  0x2f   : > { %1336 = vsyncadd (%p43_p1), [#allocation6], 4294963200  ;;  %v327_v0 = vld [vmem:[#allocation5 + $0x78] sm:$0xff]  ;;  %v326_v1 = vld [vmem:[#allocation5 + $0x70] sm:$0xff]  ;;  %s1626_s12 = scalar_lea.vmem [#allocation8], %s1015_s10  ;;  %s1025_s13 = sshll.u32 %s1414_s22, 8 }
  0x30   : > { %332 = vmatpush.msra.mxu0 %v327_v0  ;;  %1026 = vmatpush.msra.mxu2 %v327_v0  ;;  %v325_v2 = vld [vmem:[#allocation5 + $0x68] sm:$0xff]  ;;  %v324_v3 = vld [vmem:[#allocation5 + $0x60] sm:$0xff]  ;;  %v323_v4 = vld [vmem:[#allocation5 + $0x58] sm:$0xff]  ;;  %s910_s30 = scalar_lea.hbm %s1730_s5, %s1025_s13  ;;  %s911_s6 = sshll.u32 %s1626_s12, 4  ;;  %s912_s6 = int_to_ptr.vmem [resolvable:$true] %s911_s6 }
  0x31   : > { %v322_v5 = vld [vmem:[#allocation5 + $0x50] sm:$0xff]  ;;  %v321_v6 = vld [vmem:[#allocation5 + $0x48] sm:$0xff]  ;;  %v320_v7 = vld [vmem:[#allocation5 + $0x40] sm:$0xff]  ;;  %s913_s7 = sshll.u32 %s910_s30, 4  ;;  %s899_s26 = scalar_lea.sflag [#allocation4], %s1498_s8  ;;  %s914_s7 = int_to_ptr.hbm [resolvable:$true] %s913_s7 }
  0x32   : > { %333 = vmatpush.msra.mxu0 %v326_v1  ;;  %1027 = vmatpush.msra.mxu2 %v326_v1  ;;  %v319_v8 = vld [vmem:[#allocation5 + $0x38] sm:$0xff]  ;;  %v318_v9 = vld [vmem:[#allocation5 + $0x30] sm:$0xff]  ;;  %v317_v10 = vld [vmem:[#allocation5 + $0x28] sm:$0xff]  ;;  %s1299_s10 = sshra.s32 %s914_s7, 4  ;;  %s1305_s24 = scalar_lea.hbm %s1730_s5, 512  ;;  %s1300_s10 = int_to_ptr.hbm [resolvable:$true] %s1299_s10 }
  0x33   : > { %v316_v11 = vld [vmem:[#allocation5 + $0x20] sm:$0xff]  ;;  %v315_v12 = vld [vmem:[#allocation5 + $0x18] sm:$0xff]  ;;  %v314_v13 = vld [vmem:[#allocation5 + $0x10] sm:$0xff]  ;;  %s1301_s22 = scalar_lea.hbm %s1300_s10, 256  ;;  %p1306_p11 = scmp.lt.s32.totalorder %s1300_s10, %s1730_s5 }
  0x34   : > { %334 = vmatpush.msra.mxu0 %v325_v2  ;;  %1028 = vmatpush.msra.mxu2 %v325_v2  ;;  %v313_v14 = vld [vmem:[#allocation5 + $0x8] sm:$0xff]  ;;  %v312_v15 = vld [vmem:[#allocation5] sm:$0xff]  ;;  %v282_v20 = vld [vmem:[%s1504_s28 + $0x10] sm:$0xff]  ;;  %p1302_p1 = scmp.ne.s32.totalorder %s1300_s10, %s1301_s22  ;;  %p1307_p2 = scmp.lt.s32.totalorder %s1305_s24, %s1301_s22 }
  0x35   : > { %v280_v16 = vld [vmem:[%s1504_s28] sm:$0xff]  ;;  %v281_v18 = vld [vmem:[%s1504_s28 + $0x8] sm:$0xff]  ;;  %v298_v21 = vld [vmem:[%s1504_s28 + $0x90] sm:$0xff] }
  0x36   : > { %335 = vmatpush.msra.mxu0 %v324_v3  ;;  %1029 = vmatpush.msra.mxu2 %v324_v3  ;;  %v296_v17 = vld [vmem:[%s1504_s28 + $0x80] sm:$0xff]  ;;  %v297_v19 = vld [vmem:[%s1504_s28 + $0x88] sm:$0xff]  ;;  %v283_v22 = vld [vmem:[%s1504_s28 + $0x18] sm:$0xff]  ;;  %p1303_p4 = pnand %p1302_p1, %p1465_p3  ;;  %p1308_p9 = por %p1307_p2, %p1306_p11 }
  0x37   : > { %v299_v23 = vld [vmem:[%s1504_s28 + $0x98] sm:$0xff]  ;;  %v284_v24 = vld [vmem:[%s1504_s28 + $0x20] sm:$0xff]  ;;  %v285_v26 = vld [vmem:[%s1504_s28 + $0x28] sm:$0xff] }
  0x38   : > { %336 = vmatpush.msra.mxu0 %v323_v4  ;;  %1030 = vmatpush.msra.mxu2 %v323_v4  ;;  %v300_v25 = vld [vmem:[%s1504_s28 + $0xa0] sm:$0xff]  ;;  %v301_v27 = vld [vmem:[%s1504_s28 + $0xa8] sm:$0xff]  ;;  %v286_v28 = vld [vmem:[%s1504_s28 + $0x30] sm:$0xff]  ;;  %p1304_p8 = pneg %p1303_p4 }
  0x39   : > { %v302_v29 = vld [vmem:[%s1504_s28 + $0xb0] sm:$0xff]  ;;  %v287_v30 = vld [vmem:[%s1504_s28 + $0x38] sm:$0xff]  ;;  %v288_v32 = vld [vmem:[%s1504_s28 + $0x40] sm:$0xff] }
  0x3a   : > { %337 = vmatpush.msra.mxu0 %v322_v5  ;;  %1031 = vmatpush.msra.mxu2 %v322_v5  ;;  %v303_v31 = vld [vmem:[%s1504_s28 + $0xb8] sm:$0xff]  ;;  %v304_v33 = vld [vmem:[%s1504_s28 + $0xc0] sm:$0xff]  ;;  %v289_v34 = vld [vmem:[%s1504_s28 + $0x48] sm:$0xff]  ;;  %p1309_p10 = pnand %p1308_p9, %p1304_p8 }
  0x3b   : > { %v305_v35 = vld [vmem:[%s1504_s28 + $0xc8] sm:$0xff]  ;;  %v290_v36 = vld [vmem:[%s1504_s28 + $0x50] sm:$0xff]  ;;  %v748_v38 = vld [vmem:[#allocation7 + $0x78] sm:$0xff] }
  0x3c   : > { %338 = vmatpush.msra.mxu0 %v321_v6  ;;  %1032 = vmatpush.msra.mxu2 %v321_v6  ;;  %v306_v37 = vld [vmem:[%s1504_s28 + $0xd0] sm:$0xff]  ;;  %v291_v39 = vld [vmem:[%s1504_s28 + $0x58] sm:$0xff]  ;;  %v746_v42 = vld [vmem:[#allocation7 + $0x68] sm:$0xff] }
  0x3d   : > { %753 = vmatpush.msra.mxu1 %v748_v38  ;;  %1042 = vmatpush.msra.mxu3 %v748_v38  ;;  %v307_v40 = vld [vmem:[%s1504_s28 + $0xd8] sm:$0xff]  ;;  %v747_v41 = vld [vmem:[#allocation7 + $0x70] sm:$0xff]  ;;  %v745_v43 = vld [vmem:[#allocation7 + $0x60] sm:$0xff] }
  0x3e   : > { %339 = vmatpush.msra.mxu0 %v320_v7  ;;  %1033 = vmatpush.msra.mxu2 %v320_v7  ;;  %v292_v44 = vld [vmem:[%s1504_s28 + $0x60] sm:$0xff]  ;;  %v744_v46 = vld [vmem:[#allocation7 + $0x58] sm:$0xff]  ;;  %v743_v47 = vld [vmem:[#allocation7 + $0x50] sm:$0xff] }
  0x3f   : > { %754 = vmatpush.msra.mxu1 %v747_v41  ;;  %1043 = vmatpush.msra.mxu3 %v747_v41  ;;  %v308_v45 = vld [vmem:[%s1504_s28 + $0xe0] sm:$0xff]  ;;  %v742_v48 = vld [vmem:[#allocation7 + $0x48] sm:$0xff]  ;;  %v740_v52 = vld [vmem:[#allocation7 + $0x38] sm:$0xff] }
  0x40   : > { %340 = vmatpush.msra.mxu0 %v319_v8  ;;  %1034 = vmatpush.msra.mxu2 %v319_v8  ;;  %v741_v49 = vld [vmem:[#allocation7 + $0x40] sm:$0xff]  ;;  %v293_v50 = vld [vmem:[%s1504_s28 + $0x68] sm:$0xff]  ;;  %v739_v53 = vld [vmem:[#allocation7 + $0x30] sm:$0xff] }
  0x41   : > { %755 = vmatpush.msra.mxu1 %v746_v42  ;;  %1044 = vmatpush.msra.mxu3 %v746_v42  ;;  %v309_v51 = vld [vmem:[%s1504_s28 + $0xe8] sm:$0xff]  ;;  %v737_v55 = vld [vmem:[#allocation7 + $0x20] sm:$0xff]  ;;  %v294_v56 = vld [vmem:[%s1504_s28 + $0x70] sm:$0xff] }
  0x42   : > { %341 = vmatpush.msra.mxu0 %v318_v9  ;;  %1035 = vmatpush.msra.mxu2 %v318_v9  ;;  %v738_v54 = vld [vmem:[#allocation7 + $0x28] sm:$0xff]  ;;  %v310_v57 = vld [vmem:[%s1504_s28 + $0xf0] sm:$0xff]  ;;  %v736_v58 = vld [vmem:[#allocation7 + $0x18] sm:$0xff] }
  0x43   : > { %756 = vmatpush.msra.mxu1 %v745_v43  ;;  %1045 = vmatpush.msra.mxu3 %v745_v43  ;;  %v735_v59 = vld [vmem:[#allocation7 + $0x10] sm:$0xff]  ;;  %v734_v60 = vld [vmem:[#allocation7 + $0x8] sm:$0xff]  ;;  %v733_v61 = vld [vmem:[#allocation7] sm:$0xff] }
  0x44   : > { %342 = vmatpush.msra.mxu0 %v317_v10  ;;  %1036 = vmatpush.msra.mxu2 %v317_v10  ;;  %v295_v62 = vld [vmem:[%s1504_s28 + $0x78] sm:$0xff]  ;;  %v1549_v0 = vld [vmem:[%s1727_s2] ss:$0 sm:$0xff] }
  0x45   : > { %757 = vmatpush.msra.mxu1 %v744_v46  ;;  %1046 = vmatpush.msra.mxu3 %v744_v46  ;;  %v311_v63 = vld [vmem:[%s1504_s28 + $0xf8] sm:$0xff] }
  0x46   : > { %343 = vmatpush.msra.mxu0 %v316_v11  ;;  %1037 = vmatpush.msra.mxu2 %v316_v11 }
  0x47   : > { %758 = vmatpush.msra.mxu1 %v743_v47  ;;  %1047 = vmatpush.msra.mxu3 %v743_v47 }
  0x48   : > { %344 = vmatpush.msra.mxu0 %v315_v12  ;;  %1038 = vmatpush.msra.mxu2 %v315_v12 }
  0x49   : > { %759 = vmatpush.msra.mxu1 %v742_v48  ;;  %1048 = vmatpush.msra.mxu3 %v742_v48 }
  0x4a   : > { %345 = vmatpush.msra.mxu0 %v314_v13  ;;  %1039 = vmatpush.msra.mxu2 %v314_v13 }
  0x4b   : > { %760 = vmatpush.msra.mxu1 %v741_v49  ;;  %1049 = vmatpush.msra.mxu3 %v741_v49 }
  0x4c   : > { %346 = vmatpush.msra.mxu0 %v313_v14  ;;  %1040 = vmatpush.msra.mxu2 %v313_v14 }
  0x4d   : > { %761 = vmatpush.msra.mxu1 %v740_v52  ;;  %1050 = vmatpush.msra.mxu3 %v740_v52 }
  0x4e   : > { %347 = vmatpush.msra.mxu0 %v312_v15  ;;  %1041 = vmatpush.msra.mxu2 %v312_v15 }
  0x4f   : > { %348 = vmatmul.f32.vlgmr.msra.gmra.mxu0 %v280_v16  ;;  %396 = vmatmul.f32.vlgmr.msra.gmra.mxu2 %v296_v17 }
  0x50   : > { %762 = vmatpush.msra.mxu1 %v739_v53  ;;  %1051 = vmatpush.msra.mxu3 %v739_v53 }
  0x52   : > { %763 = vmatpush.msra.mxu1 %v738_v54  ;;  %1052 = vmatpush.msra.mxu3 %v738_v54 }
  0x54   : > { %764 = vmatpush.msra.mxu1 %v737_v55  ;;  %1053 = vmatpush.msra.mxu3 %v737_v55 }
  0x56   : > { %765 = vmatpush.msra.mxu1 %v736_v58  ;;  %1054 = vmatpush.msra.mxu3 %v736_v58 }
  0x57   : > { %351 = vmatmul.f32.gmra.mxu0 %v281_v18  ;;  %399 = vmatmul.f32.gmra.mxu2 %v297_v19 }
  0x58   : > { %766 = vmatpush.msra.mxu1 %v735_v59  ;;  %1055 = vmatpush.msra.mxu3 %v735_v59 }
  0x5a   : > { %767 = vmatpush.msra.mxu1 %v734_v60  ;;  %1056 = vmatpush.msra.mxu3 %v734_v60 }
  0x5c   : > { %768 = vmatpush.msra.mxu1 %v733_v61  ;;  %1057 = vmatpush.msra.mxu3 %v733_v61 }
  0x5f   : > { %354 = vmatmul.f32.gmra.mxu0 %v282_v20  ;;  %402 = vmatmul.f32.gmra.mxu2 %v298_v21 }
  0x67   : > { %357 = vmatmul.f32.gmra.mxu0 %v283_v22  ;;  %405 = vmatmul.f32.gmra.mxu2 %v299_v23 }
  0x6f   : > { %360 = vmatmul.f32.gmra.mxu0 %v284_v24  ;;  %408 = vmatmul.f32.gmra.mxu2 %v300_v25 }
  0x77   : > { %363 = vmatmul.f32.gmra.mxu0 %v285_v26  ;;  %411 = vmatmul.f32.gmra.mxu2 %v301_v27 }
  0x7f   : > { %366 = vmatmul.f32.gmra.mxu0 %v286_v28  ;;  %414 = vmatmul.f32.gmra.mxu2 %v302_v29 }
  0x87   : > { %369 = vmatmul.f32.gmra.mxu0 %v287_v30  ;;  %417 = vmatmul.f32.gmra.mxu2 %v303_v31 }
  0x8f   : > { %372 = vmatmul.f32.gmra.mxu0 %v288_v32  ;;  %420 = vmatmul.f32.gmra.mxu2 %v304_v33 }
  0x97   : > { %375 = vmatmul.f32.gmra.mxu0 %v289_v34  ;;  %423 = vmatmul.f32.gmra.mxu2 %v305_v35 }
  0x9f   : > { %378 = vmatmul.f32.gmra.mxu0 %v290_v36  ;;  %426 = vmatmul.f32.gmra.mxu2 %v306_v37 }
  0xa7   : > { %381 = vmatmul.f32.gmra.mxu0 %v291_v39  ;;  %429 = vmatmul.f32.gmra.mxu2 %v307_v40 }
  0xaf   : > { %384 = vmatmul.f32.gmra.mxu0 %v292_v44  ;;  %432 = vmatmul.f32.gmra.mxu2 %v308_v45 }
  0xb7   : > { %387 = vmatmul.f32.gmra.mxu0 %v293_v50  ;;  %435 = vmatmul.f32.gmra.mxu2 %v309_v51 }
  0xbf   : > { %390 = vmatmul.f32.gmra.mxu0 %v294_v56  ;;  %438 = vmatmul.f32.gmra.mxu2 %v310_v57 }
  0xc7   : > { %393 = vmatmul.f32.gmra.mxu0 %v295_v62  ;;  %441 = vmatmul.f32.gmra.mxu2 %v311_v63 }
  0xcc   : > { %v349_v1 = vpop.f32.mrf.mxu0 }
  0xcd   : > { %v350_v2 = vadd.f32 %v1549_v0, %v349_v1 }
  0xcf   : > { %v477_v3 = vmul.f32 0.044715, %v350_v2  ;;  %v445_v29 = vmul.f32 0.5, %v350_v2 }
  0xd1   : > { %v509_v4 = vmul.f32 %v477_v3, %v350_v2 }
  0xd2   : > { %v397_v5 = vpop.f32.mrf.mxu2 }
  0xd3   : > { %v398_v6 = vadd.f32 %v1549_v0, %v397_v5  ;;  %v541_v7 = vmul.f32 %v509_v4, %v350_v2 }
  0xd4   : > { %v352_v8 = vpop.f32.mrf.mxu0 }
  0xd5   : > { %v353_v9 = vadd.f32 %v1549_v0, %v352_v8  ;;  %v573_v10 = vadd.f32 %v541_v7, %v350_v2  ;;  %v493_v11 = vmul.f32 0.044715, %v398_v6  ;;  %v461_v44 = vmul.f32 0.5, %v398_v6 }
  0xd7   : > { %v605_v12 = vmul.f32 0.7978846, %v573_v10  ;;  %v525_v13 = vmul.f32 %v493_v11, %v398_v6  ;;  %v478_v14 = vmul.f32 0.044715, %v353_v9  ;;  %v446_v52 = vmul.f32 0.5, %v353_v9 }
  0xd9   : > { %1131 = vtanh.f32 %v605_v12  ;;  %v557_v15 = vmul.f32 %v525_v13, %v398_v6  ;;  %v510_v16 = vmul.f32 %v478_v14, %v353_v9 }
  0xda   : > { %v400_v17 = vpop.f32.mrf.mxu2 }
  0xdb   : > { %v401_v18 = vadd.f32 %v1549_v0, %v400_v17  ;;  %v589_v19 = vadd.f32 %v557_v15, %v398_v6  ;;  %v542_v20 = vmul.f32 %v510_v16, %v353_v9 }
  0xdc   : > { %v355_v21 = vpop.f32.mrf.mxu0 }
  0xdd   : > { %v356_v22 = vadd.f32 %v1549_v0, %v355_v21  ;;  %v621_v23 = vmul.f32 0.7978846, %v589_v19  ;;  %v574_v24 = vadd.f32 %v542_v20, %v353_v9  ;;  %v494_v25 = vmul.f32 0.044715, %v401_v18 }
  0xde   : > { %v462_v5 = vmul.f32 0.5, %v401_v18 }
  0xdf   : > { %v1132_v26 = vpop.eup %1131  ;;  %1133 = vtanh.f32 %v621_v23  ;;  %v606_v27 = vmul.f32 0.7978846, %v574_v24  ;;  %v479_v28 = vmul.f32 0.044715, %v356_v22  ;;  %v526_v31 = vmul.f32 %v494_v25, %v401_v18 }
  0xe0   : > { %v669_v30 = vadd.f32 1.0, %v1132_v26  ;;  %v447_v8 = vmul.f32 0.5, %v356_v22 }
  0xe1   : > { %1135 = vtanh.f32 %v606_v27  ;;  %v511_v32 = vmul.f32 %v479_v28, %v356_v22  ;;  %v558_v35 = vmul.f32 %v526_v31, %v401_v18 }
  0xe2   : > { %v403_v33 = vpop.f32.mrf.mxu2  ;;  %v701_v34 = vmul.f32 %v669_v30, %v445_v29 }
  0xe3   : > { %v404_v36 = vadd.f32 %v1549_v0, %v403_v33  ;;  %v543_v37 = vmul.f32 %v511_v32, %v356_v22  ;;  %v590_v39 = vadd.f32 %v558_v35, %v401_v18 }
  0xe4   : > { %v358_v38 = vpop.f32.mrf.mxu0  ;;  %769 = vmatmul.f32.vlgmr.msra.gmra.mxu1 %v701_v34 }
  0xe5   : > { %v1134_v40 = vpop.eup %1133  ;;  %v359_v41 = vadd.f32 %v1549_v0, %v358_v38  ;;  %v575_v42 = vadd.f32 %v543_v37, %v356_v22  ;;  %v495_v43 = vmul.f32 0.044715, %v404_v36  ;;  %v622_v46 = vmul.f32 0.7978846, %v590_v39 }
  0xe6   : > { %v685_v45 = vadd.f32 1.0, %v1134_v40  ;;  %v463_v24 = vmul.f32 0.5, %v404_v36 }
  0xe7   : > { %v1136_v47 = vpop.eup %1135  ;;  %v607_v48 = vmul.f32 0.7978846, %v575_v42  ;;  %v527_v49 = vmul.f32 %v495_v43, %v404_v36  ;;  %v480_v50 = vmul.f32 0.044715, %v359_v41  ;;  %1137 = vtanh.f32 %v622_v46 }
  0xe8   : > { %v717_v51 = vmul.f32 %v685_v45, %v461_v44  ;;  %v670_v53 = vadd.f32 1.0, %v1136_v47  ;;  %v448_v29 = vmul.f32 0.5, %v359_v41 }
  0xe9   : > { %1139 = vtanh.f32 %v607_v48  ;;  %v559_v54 = vmul.f32 %v527_v49, %v404_v36  ;;  %v512_v55 = vmul.f32 %v480_v50, %v359_v41 }
  0xea   : > { %v406_v56 = vpop.f32.mrf.mxu2  ;;  %817 = vmatmul.f32.vlgmr.msra.gmra.mxu3 %v717_v51  ;;  %v702_v57 = vmul.f32 %v670_v53, %v446_v52 }
  0xeb   : > { %v407_v58 = vadd.f32 %v1549_v0, %v406_v56  ;;  %v591_v59 = vadd.f32 %v559_v54, %v404_v36  ;;  %v544_v60 = vmul.f32 %v512_v55, %v359_v41 }
  0xec   : > { %v361_v61 = vpop.f32.mrf.mxu0  ;;  %772 = vmatmul.f32.gmra.mxu1 %v702_v57 }
  0xed   : > { %v1560_v62 = vadd.f32 %v1549_v0, %v361_v61  ;;  %v623_v63 = vmul.f32 0.7978846, %v591_v59  ;;  %v576_v1 = vadd.f32 %v544_v60, %v359_v41  ;;  %v1138_v2 = vpop.eup %1137  ;;  %v496_v3 = vmul.f32 0.044715, %v407_v58 }
  0xee   : > { %v686_v6 = vadd.f32 1.0, %v1138_v2  ;;  %v464_v48 = vmul.f32 0.5, %v407_v58 }
  0xef   : > { %v1140_v4 = vpop.eup %1139  ;;  %1141 = vtanh.f32 %v623_v63  ;;  %v608_v7 = vmul.f32 0.7978846, %v576_v1  ;;  %v528_v10 = vmul.f32 %v496_v3, %v407_v58  ;;  %v481_v11 = vmul.f32 0.044715, %v1560_v62 }
  0xf0   : > { %v671_v9 = vadd.f32 1.0, %v1140_v4  ;;  %v718_v12 = vmul.f32 %v686_v6, %v462_v5  ;;  %v449_v55 = vmul.f32 0.5, %v1560_v62 }
  0xf1   : > { %1143 = vtanh.f32 %v608_v7  ;;  %v560_v15 = vmul.f32 %v528_v10, %v407_v58  ;;  %v513_v16 = vmul.f32 %v481_v11, %v1560_v62 }
  0xf2   : > { %v409_v13 = vpop.f32.mrf.mxu2  ;;  %v703_v14 = vmul.f32 %v671_v9, %v447_v8  ;;  %820 = vmatmul.f32.gmra.mxu3 %v718_v12 }
  0xf3   : > { %v410_v17 = vadd.f32 %v1549_v0, %v409_v13  ;;  %v592_v18 = vadd.f32 %v560_v15, %v407_v58  ;;  %v545_v20 = vmul.f32 %v513_v16, %v1560_v62 }
  0xf4   : > { %v364_v19 = vpop.f32.mrf.mxu0  ;;  %775 = vmatmul.f32.gmra.mxu1 %v703_v14 }
  0xf5   : > { %v1142_v21 = vpop.eup %1141  ;;  %v365_v22 = vadd.f32 %v1549_v0, %v364_v19  ;;  %v497_v23 = vmul.f32 0.044715, %v410_v17  ;;  %v624_v26 = vmul.f32 0.7978846, %v592_v18  ;;  %v577_v27 = vadd.f32 %v545_v20, %v1560_v62 }
  0xf6   : > { %v687_v25 = vadd.f32 1.0, %v1142_v21  ;;  %v465_v62 = vmul.f32 0.5, %v410_v17 }
  0xf7   : > { %v1144_v28 = vpop.eup %1143  ;;  %v529_v30 = vmul.f32 %v497_v23, %v410_v17  ;;  %v482_v31 = vmul.f32 0.044715, %v365_v22  ;;  %1145 = vtanh.f32 %v624_v26  ;;  %v609_v34 = vmul.f32 0.7978846, %v577_v27 }
  0xf8   : > { %v719_v32 = vmul.f32 %v687_v25, %v463_v24  ;;  %v672_v33 = vadd.f32 1.0, %v1144_v28  ;;  %v450_v10 = vmul.f32 0.5, %v365_v22 }
  0xf9   : > { %v561_v35 = vmul.f32 %v529_v30, %v410_v17  ;;  %v514_v37 = vmul.f32 %v482_v31, %v365_v22  ;;  %1147 = vtanh.f32 %v609_v34 }
  0xfa   : > { %v412_v38 = vpop.f32.mrf.mxu2  ;;  %v704_v39 = vmul.f32 %v672_v33, %v448_v29  ;;  %823 = vmatmul.f32.gmra.mxu3 %v719_v32 }
  0xfb   : > { %v413_v40 = vadd.f32 %v1549_v0, %v412_v38  ;;  %v593_v36 = vadd.f32 %v561_v35, %v410_v17  ;;  %v546_v42 = vmul.f32 %v514_v37, %v365_v22 }
  0xfc   : > { %v367_v43 = vpop.f32.mrf.mxu0  ;;  %778 = vmatmul.f32.gmra.mxu1 %v704_v39 }
  0xfd   : > { %v1570_v41 = vadd.f32 %v1549_v0, %v367_v43  ;;  %v625_v44 = vmul.f32 0.7978846, %v593_v36  ;;  %v578_v45 = vadd.f32 %v546_v42, %v365_v22  ;;  %v1146_v46 = vpop.eup %1145  ;;  %v498_v47 = vmul.f32 0.044715, %v413_v40 }
  0xfe   : > { %v688_v49 = vadd.f32 1.0, %v1146_v46  ;;  %v466_v29 = vmul.f32 0.5, %v413_v40 }
  0xff   : > { %1149 = vtanh.f32 %v625_v44  ;;  %v610_v50 = vmul.f32 0.7978846, %v578_v45  ;;  %v1148_v51 = vpop.eup %1147  ;;  %v530_v52 = vmul.f32 %v498_v47, %v413_v40  ;;  %v483_v53 = vmul.f32 0.044715, %v1570_v41 }
 0x100   : > { %v720_v54 = vmul.f32 %v688_v49, %v464_v48  ;;  %v673_v56 = vadd.f32 1.0, %v1148_v51  ;;  %v451_v37 = vmul.f32 0.5, %v1570_v41 }
 0x101   : > { %1151 = vtanh.f32 %v610_v50  ;;  %v562_v59 = vmul.f32 %v530_v52, %v413_v40  ;;  %v515_v60 = vmul.f32 %v483_v53, %v1570_v41 }
 0x102   : > { %v415_v57 = vpop.f32.mrf.mxu2  ;;  %826 = vmatmul.f32.gmra.mxu3 %v720_v54  ;;  %v705_v58 = vmul.f32 %v673_v56, %v449_v55 }
 0x103   : > { %v416_v61 = vadd.f32 %v1549_v0, %v415_v57  ;;  %v594_v1 = vadd.f32 %v562_v59, %v413_v40  ;;  %v547_v2 = vmul.f32 %v515_v60, %v1570_v41 }
 0x104   : > { %v370_v63 = vpop.f32.mrf.mxu0  ;;  %781 = vmatmul.f32.gmra.mxu1 %v705_v58 }
 0x105   : > { %v1150_v3 = vpop.eup %1149  ;;  %v371_v4 = vadd.f32 %v1549_v0, %v370_v63  ;;  %v499_v5 = vmul.f32 0.044715, %v416_v61  ;;  %v626_v7 = vmul.f32 0.7978846, %v594_v1  ;;  %v579_v8 = vadd.f32 %v547_v2, %v1570_v41 }
 0x106   : > { %v689_v6 = vadd.f32 1.0, %v1150_v3  ;;  %v467_v41 = vmul.f32 0.5, %v416_v61 }
 0x107   : > { %v1152_v9 = vpop.eup %1151  ;;  %v531_v11 = vmul.f32 %v499_v5, %v416_v61  ;;  %v484_v12 = vmul.f32 0.044715, %v371_v4  ;;  %1153 = vtanh.f32 %v626_v7  ;;  %v611_v15 = vmul.f32 0.7978846, %v579_v8 }
 0x108   : > { %v721_v13 = vmul.f32 %v689_v6, %v465_v62  ;;  %v674_v14 = vadd.f32 1.0, %v1152_v9  ;;  %v452_v54 = vmul.f32 0.5, %v371_v4 }
 0x109   : > { %v563_v16 = vmul.f32 %v531_v11, %v416_v61  ;;  %v516_v19 = vmul.f32 %v484_v12, %v371_v4  ;;  %1155 = vtanh.f32 %v611_v15 }
 0x10a   : > { %v418_v18 = vpop.f32.mrf.mxu2  ;;  %v706_v20 = vmul.f32 %v674_v14, %v450_v10  ;;  %829 = vmatmul.f32.gmra.mxu3 %v721_v13 }
 0x10b   : > { %v419_v21 = vadd.f32 %v1549_v0, %v418_v18  ;;  %v595_v17 = vadd.f32 %v563_v16, %v416_v61  ;;  %v548_v23 = vmul.f32 %v516_v19, %v371_v4 }
 0x10c   : > { %v373_v24 = vpop.f32.mrf.mxu0  ;;  %784 = vmatmul.f32.gmra.mxu1 %v706_v20 }
 0x10d   : > { %v1581_v25 = vadd.f32 %v1549_v0, %v373_v24  ;;  %v627_v22 = vmul.f32 0.7978846, %v595_v17  ;;  %v580_v26 = vadd.f32 %v548_v23, %v371_v4  ;;  %v1154_v27 = vpop.eup %1153  ;;  %v500_v28 = vmul.f32 0.044715, %v419_v21 }
 0x10e   : > { %v690_v30 = vadd.f32 1.0, %v1154_v27  ;;  %v468_v10 = vmul.f32 0.5, %v419_v21 }
 0x10f   : > { %1157 = vtanh.f32 %v627_v22  ;;  %v612_v31 = vmul.f32 0.7978846, %v580_v26  ;;  %v1156_v32 = vpop.eup %1155  ;;  %v532_v33 = vmul.f32 %v500_v28, %v419_v21  ;;  %v485_v34 = vmul.f32 0.044715, %v1581_v25 }
 0x110   : > { %v722_v35 = vmul.f32 %v690_v30, %v466_v29  ;;  %v675_v38 = vadd.f32 1.0, %v1156_v32  ;;  %v453_v19 = vmul.f32 0.5, %v1581_v25 }
 0x111   : > { %1159 = vtanh.f32 %v612_v31  ;;  %v564_v36 = vmul.f32 %v532_v33, %v419_v21  ;;  %v517_v42 = vmul.f32 %v485_v34, %v1581_v25 }
 0x112   : > { %v421_v39 = vpop.f32.mrf.mxu2  ;;  %832 = vmatmul.f32.gmra.mxu3 %v722_v35  ;;  %v707_v40 = vmul.f32 %v675_v38, %v451_v37 }
 0x113   : > { %v422_v43 = vadd.f32 %v1549_v0, %v421_v39  ;;  %v596_v45 = vadd.f32 %v564_v36, %v419_v21  ;;  %v549_v46 = vmul.f32 %v517_v42, %v1581_v25 }
 0x114   : > { %v376_v44 = vpop.f32.mrf.mxu0  ;;  %787 = vmatmul.f32.gmra.mxu1 %v707_v40 }
 0x115   : > { %v1158_v47 = vpop.eup %1157  ;;  %v377_v48 = vadd.f32 %v1549_v0, %v376_v44  ;;  %v501_v49 = vmul.f32 0.044715, %v422_v43  ;;  %v628_v51 = vmul.f32 0.7978846, %v596_v45  ;;  %v581_v52 = vadd.f32 %v549_v46, %v1581_v25 }
 0x116   : > { %v691_v50 = vadd.f32 1.0, %v1158_v47  ;;  %v469_v25 = vmul.f32 0.5, %v422_v43 }
 0x117   : > { %v1160_v53 = vpop.eup %1159  ;;  %v533_v55 = vmul.f32 %v501_v49, %v422_v43  ;;  %v486_v56 = vmul.f32 0.044715, %v377_v48  ;;  %1161 = vtanh.f32 %v628_v51  ;;  %v613_v60 = vmul.f32 0.7978846, %v581_v52 }
 0x118   : > { %v723_v57 = vmul.f32 %v691_v50, %v467_v41  ;;  %v676_v59 = vadd.f32 1.0, %v1160_v53  ;;  %v454_v35 = vmul.f32 0.5, %v377_v48 }
 0x119   : > { %v565_v58 = vmul.f32 %v533_v55, %v422_v43  ;;  %v518_v63 = vmul.f32 %v486_v56, %v377_v48  ;;  %1163 = vtanh.f32 %v613_v60 }
 0x11a   : > { %v424_v1 = vpop.f32.mrf.mxu2  ;;  %v708_v2 = vmul.f32 %v676_v59, %v452_v54  ;;  %835 = vmatmul.f32.gmra.mxu3 %v723_v57 }
 0x11b   : > { %v425_v3 = vadd.f32 %v1549_v0, %v424_v1  ;;  %v597_v61 = vadd.f32 %v565_v58, %v422_v43  ;;  %v550_v5 = vmul.f32 %v518_v63, %v377_v48 }
 0x11c   : > { %v379_v62 = vpop.f32.mrf.mxu0  ;;  %790 = vmatmul.f32.gmra.mxu1 %v708_v2 }
 0x11d   : > { %v1592_v6 = vadd.f32 %v1549_v0, %v379_v62  ;;  %v629_v4 = vmul.f32 0.7978846, %v597_v61  ;;  %v582_v7 = vadd.f32 %v550_v5, %v377_v48  ;;  %v1162_v8 = vpop.eup %1161  ;;  %v502_v9 = vmul.f32 0.044715, %v425_v3 }
 0x11e   : > { %v692_v11 = vadd.f32 1.0, %v1162_v8  ;;  %v470_v54 = vmul.f32 0.5, %v425_v3 }
 0x11f   : > { %1165 = vtanh.f32 %v629_v4  ;;  %v614_v12 = vmul.f32 0.7978846, %v582_v7  ;;  %v1164_v13 = vpop.eup %1163  ;;  %v534_v14 = vmul.f32 %v502_v9, %v425_v3  ;;  %v487_v15 = vmul.f32 0.044715, %v1592_v6 }
 0x120   : > { %v724_v16 = vmul.f32 %v692_v11, %v468_v10  ;;  %v677_v18 = vadd.f32 1.0, %v1164_v13  ;;  %v455_v63 = vmul.f32 0.5, %v1592_v6 }
 0x121   : > { %1167 = vtanh.f32 %v614_v12  ;;  %v566_v17 = vmul.f32 %v534_v14, %v425_v3  ;;  %v519_v23 = vmul.f32 %v487_v15, %v1592_v6 }
 0x122   : > { %v427_v20 = vpop.f32.mrf.mxu2  ;;  %838 = vmatmul.f32.gmra.mxu3 %v724_v16  ;;  %v709_v21 = vmul.f32 %v677_v18, %v453_v19 }
 0x123   : > { %v428_v24 = vadd.f32 %v1549_v0, %v427_v20  ;;  %v598_v26 = vadd.f32 %v566_v17, %v425_v3  ;;  %v551_v27 = vmul.f32 %v519_v23, %v1592_v6 }
 0x124   : > { %v382_v22 = vpop.f32.mrf.mxu0  ;;  %793 = vmatmul.f32.gmra.mxu1 %v709_v21 }
 0x125   : > { %v1166_v28 = vpop.eup %1165  ;;  %v383_v29 = vadd.f32 %v1549_v0, %v382_v22  ;;  %v503_v30 = vmul.f32 0.044715, %v428_v24  ;;  %v630_v32 = vmul.f32 0.7978846, %v598_v26  ;;  %v583_v33 = vadd.f32 %v551_v27, %v1592_v6 }
 0x126   : > { %v693_v31 = vadd.f32 1.0, %v1166_v28  ;;  %v471_v6 = vmul.f32 0.5, %v428_v24 }
 0x127   : > { %v1168_v34 = vpop.eup %1167  ;;  %v535_v37 = vmul.f32 %v503_v30, %v428_v24  ;;  %v488_v38 = vmul.f32 0.044715, %v383_v29  ;;  %1169 = vtanh.f32 %v630_v32  ;;  %v615_v42 = vmul.f32 0.7978846, %v583_v33 }
 0x128   : > { %v725_v39 = vmul.f32 %v693_v31, %v469_v25  ;;  %v678_v36 = vadd.f32 1.0, %v1168_v34  ;;  %v456_v16 = vmul.f32 0.5, %v383_v29 }
 0x129   : > { %v567_v40 = vmul.f32 %v535_v37, %v428_v24  ;;  %v520_v44 = vmul.f32 %v488_v38, %v383_v29  ;;  %1171 = vtanh.f32 %v615_v42 }
 0x12a   : > { %v430_v45 = vpop.f32.mrf.mxu2  ;;  %v710_v46 = vmul.f32 %v678_v36, %v454_v35  ;;  %841 = vmatmul.f32.gmra.mxu3 %v725_v39 }
 0x12b   : > { %v431_v47 = vadd.f32 %v1549_v0, %v430_v45  ;;  %v599_v43 = vadd.f32 %v567_v40, %v428_v24  ;;  %v552_v49 = vmul.f32 %v520_v44, %v383_v29 }
 0x12c   : > { %v385_v41 = vpop.f32.mrf.mxu0  ;;  %796 = vmatmul.f32.gmra.mxu1 %v710_v46 }
 0x12d   : > { %v1603_v50 = vadd.f32 %v1549_v0, %v385_v41  ;;  %v631_v48 = vmul.f32 0.7978846, %v599_v43  ;;  %v584_v51 = vadd.f32 %v552_v49, %v383_v29  ;;  %v1170_v52 = vpop.eup %1169  ;;  %v504_v53 = vmul.f32 0.044715, %v431_v47 }
 0x12e   : > { %v694_v55 = vadd.f32 1.0, %v1170_v52  ;;  %v472_v35 = vmul.f32 0.5, %v431_v47 }
 0x12f   : > { %1173 = vtanh.f32 %v631_v48  ;;  %v616_v56 = vmul.f32 0.7978846, %v584_v51  ;;  %v1172_v57 = vpop.eup %1171  ;;  %v536_v59 = vmul.f32 %v504_v53, %v431_v47  ;;  %v489_v60 = vmul.f32 0.044715, %v1603_v50 }
 0x130   : > { %v726_v58 = vmul.f32 %v694_v55, %v470_v54  ;;  %v679_v1 = vadd.f32 1.0, %v1172_v57  ;;  %v457_v44 = vmul.f32 0.5, %v1603_v50 }
 0x131   : > { %1175 = vtanh.f32 %v616_v56  ;;  %v568_v61 = vmul.f32 %v536_v59, %v431_v47  ;;  %v521_v5 = vmul.f32 %v489_v60, %v1603_v50 }
 0x132   : > { %v433_v2 = vpop.f32.mrf.mxu2  ;;  %844 = vmatmul.f32.gmra.mxu3 %v726_v58  ;;  %v711_v3 = vmul.f32 %v679_v1, %v455_v63 }
 0x133   : > { %v434_v62 = vadd.f32 %v1549_v0, %v433_v2  ;;  %v600_v7 = vadd.f32 %v568_v61, %v431_v47  ;;  %v553_v8 = vmul.f32 %v521_v5, %v1603_v50 }
 0x134   : > { %v388_v4 = vpop.f32.mrf.mxu0  ;;  %799 = vmatmul.f32.gmra.mxu1 %v711_v3 }
 0x135   : > { %v1174_v9 = vpop.eup %1173  ;;  %v389_v10 = vadd.f32 %v1549_v0, %v388_v4  ;;  %v505_v11 = vmul.f32 0.044715, %v434_v62  ;;  %v632_v13 = vmul.f32 0.7978846, %v600_v7  ;;  %v585_v14 = vadd.f32 %v553_v8, %v1603_v50 }
 0x136   : > { %v695_v12 = vadd.f32 1.0, %v1174_v9  ;;  %v473_v56 = vmul.f32 0.5, %v434_v62 }
 0x137   : > { %v1176_v15 = vpop.eup %1175  ;;  %v537_v19 = vmul.f32 %v505_v11, %v434_v62  ;;  %v490_v18 = vmul.f32 0.044715, %v389_v10  ;;  %1177 = vtanh.f32 %v632_v13  ;;  %v617_v23 = vmul.f32 0.7978846, %v585_v14 }
 0x138   : > { %v727_v20 = vmul.f32 %v695_v12, %v471_v6  ;;  %v680_v17 = vadd.f32 1.0, %v1176_v15  ;;  %v458_v58 = vmul.f32 0.5, %v389_v10 }
 0x139   : > { %v569_v21 = vmul.f32 %v537_v19, %v434_v62  ;;  %v522_v22 = vmul.f32 %v490_v18, %v389_v10  ;;  %1179 = vtanh.f32 %v617_v23 }
 0x13a   : > { %v436_v26 = vpop.f32.mrf.mxu2  ;;  %v712_v27 = vmul.f32 %v680_v17, %v456_v16  ;;  %847 = vmatmul.f32.gmra.mxu3 %v727_v20 }
 0x13b   : > { %v437_v28 = vadd.f32 %v1549_v0, %v436_v26  ;;  %v601_v24 = vadd.f32 %v569_v21, %v434_v62  ;;  %v554_v30 = vmul.f32 %v522_v22, %v389_v10 }
 0x13c   : > { %v391_v25 = vpop.f32.mrf.mxu0  ;;  %802 = vmatmul.f32.gmra.mxu1 %v712_v27 }
 0x13d   : > { %v392_v31 = vadd.f32 %v1549_v0, %v391_v25  ;;  %v633_v29 = vmul.f32 0.7978846, %v601_v24  ;;  %v586_v32 = vadd.f32 %v554_v30, %v389_v10  ;;  %v1178_v33 = vpop.eup %1177  ;;  %v506_v34 = vmul.f32 0.044715, %v437_v28 }
 0x13e   : > { %v696_v37 = vadd.f32 1.0, %v1178_v33  ;;  %v474_v14 = vmul.f32 0.5, %v437_v28 }
 0x13f   : > { %1181 = vtanh.f32 %v633_v29  ;;  %v618_v38 = vmul.f32 0.7978846, %v586_v32  ;;  %v1180_v39 = vpop.eup %1179  ;;  %v538_v36 = vmul.f32 %v506_v34, %v437_v28  ;;  %v491_v42 = vmul.f32 0.044715, %v392_v31  ;;  %v1621_v34 = vld [vmem:[%s1729_s4] ss:$0 sm:$0xff] }
 0x140   : > { %v728_v40 = vmul.f32 %v696_v37, %v472_v35  ;;  %v681_v45 = vadd.f32 1.0, %v1180_v39  ;;  %v459_v20 = vmul.f32 0.5, %v392_v31 }
 0x141   : > { %1183 = vtanh.f32 %v618_v38  ;;  %v570_v43 = vmul.f32 %v538_v36, %v437_v28  ;;  %v523_v49 = vmul.f32 %v491_v42, %v392_v31 }
 0x142   : > { %v439_v46 = vpop.f32.mrf.mxu2  ;;  %850 = vmatmul.f32.gmra.mxu3 %v728_v40  ;;  %v713_v48 = vmul.f32 %v681_v45, %v457_v44 }
 0x143   : > { %v440_v41 = vadd.f32 %v1549_v0, %v439_v46  ;;  %v602_v47 = vadd.f32 %v570_v43, %v437_v28  ;;  %v555_v52 = vmul.f32 %v523_v49, %v392_v31 }
 0x144   : > { %v394_v51 = vpop.f32.mrf.mxu0  ;;  %805 = vmatmul.f32.gmra.mxu1 %v713_v48 }
 0x145   : > { %v1182_v53 = vpop.eup %1181  ;;  %v395_v54 = vadd.f32 %v1549_v0, %v394_v51  ;;  %v507_v55 = vmul.f32 0.044715, %v440_v41  ;;  %v634_v50 = vmul.f32 0.7978846, %v602_v47  ;;  %v587_v59 = vadd.f32 %v555_v52, %v392_v31 }
 0x146   : > { %v697_v57 = vadd.f32 1.0, %v1182_v53  ;;  %v475_v24 = vmul.f32 0.5, %v440_v41 }
 0x147   : > { %v1184_v60 = vpop.eup %1183  ;;  %v539_v63 = vmul.f32 %v507_v55, %v440_v41  ;;  %v492_v1 = vmul.f32 0.044715, %v395_v54  ;;  %1185 = vtanh.f32 %v634_v50  ;;  %v619_v5 = vmul.f32 0.7978846, %v587_v59 }
 0x148   : > { %v729_v2 = vmul.f32 %v697_v57, %v473_v56  ;;  %v682_v61 = vadd.f32 1.0, %v1184_v60  ;;  %v460_v29 = vmul.f32 0.5, %v395_v54 }
 0x149   : > { %v571_v3 = vmul.f32 %v539_v63, %v440_v41  ;;  %v524_v4 = vmul.f32 %v492_v1, %v395_v54  ;;  %1187 = vtanh.f32 %v619_v5 }
 0x14a   : > { %v442_v7 = vpop.f32.mrf.mxu2  ;;  %v714_v8 = vmul.f32 %v682_v61, %v458_v58  ;;  %853 = vmatmul.f32.gmra.mxu3 %v729_v2 }
 0x14b   : > { %v443_v9 = vadd.f32 %v1549_v0, %v442_v7  ;;  %v603_v62 = vadd.f32 %v571_v3, %v440_v41  ;;  %v556_v11 = vmul.f32 %v524_v4, %v395_v54 }
 0x14c   : > { %808 = vmatmul.f32.gmra.mxu1 %v714_v8 }
 0x14d   : > { %v635_v6 = vmul.f32 0.7978846, %v603_v62  ;;  %v588_v12 = vadd.f32 %v556_v11, %v395_v54  ;;  %v508_v10 = vmul.f32 0.044715, %v443_v9  ;;  %v1186_v13 = vpop.eup %1185  ;;  %v476_v35 = vmul.f32 0.5, %v443_v9 }
 0x14e   : > { %v698_v15 = vadd.f32 1.0, %v1186_v13 }
 0x14f   : > { %1189 = vtanh.f32 %v635_v6  ;;  %v620_v16 = vmul.f32 0.7978846, %v588_v12  ;;  %v540_v19 = vmul.f32 %v508_v10, %v443_v9  ;;  %v1188_v18 = vpop.eup %1187 }
 0x150   : > { %v730_v17 = vmul.f32 %v698_v15, %v474_v14  ;;  %v683_v23 = vadd.f32 1.0, %v1188_v18 }
 0x151   : > { %1191 = vtanh.f32 %v620_v16  ;;  %v572_v21 = vmul.f32 %v540_v19, %v443_v9 }
 0x152   : > { %856 = vmatmul.f32.gmra.mxu3 %v730_v17  ;;  %v715_v0 = vmul.f32 %v683_v23, %v459_v20 }
 0x153   : > { %v604_v22 = vadd.f32 %v572_v21, %v443_v9 }
 0x154   : > { %811 = vmatmul.f32.gmra.mxu1 %v715_v0 }
 0x155   : > { %v1190_v26 = vpop.eup %1189  ;;  %v636_v27 = vmul.f32 0.7978846, %v604_v22 }
 0x156   : > { %v699_v30 = vadd.f32 1.0, %v1190_v26 }
 0x157   : > { %v1192_v25 = vpop.eup %1191  ;;  %1193 = vtanh.f32 %v636_v27 }
 0x158   : > { %v731_v28 = vmul.f32 %v699_v30, %v475_v24  ;;  %v684_v32 = vadd.f32 1.0, %v1192_v25 }
 0x15a   : > { %v716_v33 = vmul.f32 %v684_v32, %v460_v29  ;;  %859 = vmatmul.f32.gmra.mxu3 %v731_v28 }
 0x15c   : > { %814 = vmatmul.f32.gmra.mxu1 %v716_v33 }
 0x15d   : > { %v1194_v31 = vpop.eup %1193 }
 0x15e   : > { %v700_v37 = vadd.f32 1.0, %v1194_v31 }
 0x160   : > { %v732_v38 = vmul.f32 %v700_v37, %v476_v35 }
 0x161   : > { %v770_v39 = vpop.f32.mrf.mxu1 }
 0x162   : > { %v771_v36 = vadd.f32 %v1621_v34, %v770_v39  ;;  %862 = vmatmul.f32.gmra.mxu3 %v732_v38 }
 0x164   : > { %866 = vst [vmem:[%s1626_s12] sm:$0xff] %v771_v36 }
 0x169   : > { %v773_v42 = vpop.f32.mrf.mxu1 }
 0x16a   : > { %v774_v40 = vadd.f32 %v1621_v34, %v773_v42 }
 0x16c   : > { %867 = vst [vmem:[%s1626_s12 + $0x8] sm:$0xff] %v774_v40 }
 0x16d   : > { %v818_v44 = vpop.f32.mrf.mxu3 }
 0x16e   : > { %v819_v45 = vadd.f32 %v1621_v34, %v818_v44 }
 0x170   : > { %882 = vst [vmem:[%s1626_s12 + $0x80] sm:$0xff] %v819_v45 }
 0x171   : > { %v776_v46 = vpop.f32.mrf.mxu1 }
 0x172   : > { %v777_v43 = vadd.f32 %v1621_v34, %v776_v46 }
 0x174   : > { %868 = vst [vmem:[%s1626_s12 + $0x10] sm:$0xff] %v777_v43 }
 0x175   : > { %v821_v49 = vpop.f32.mrf.mxu3 }
 0x176   : > { %v822_v41 = vadd.f32 %v1621_v34, %v821_v49 }
 0x178   : > { %883 = vst [vmem:[%s1626_s12 + $0x88] sm:$0xff] %v822_v41 }
 0x179   : > { %v779_v48 = vpop.f32.mrf.mxu1 }
 0x17a   : > { %v780_v51 = vadd.f32 %v1621_v34, %v779_v48 }
 0x17c   : > { %869 = vst [vmem:[%s1626_s12 + $0x18] sm:$0xff] %v780_v51 }
 0x17d   : > { %v824_v47 = vpop.f32.mrf.mxu3 }
 0x17e   : > { %v825_v52 = vadd.f32 %v1621_v34, %v824_v47 }
 0x180   : > { %884 = vst [vmem:[%s1626_s12 + $0x90] sm:$0xff] %v825_v52 }
 0x181   : > { %v782_v53 = vpop.f32.mrf.mxu1 }
 0x182   : > { %v783_v54 = vadd.f32 %v1621_v34, %v782_v53 }
 0x184   : > { %870 = vst [vmem:[%s1626_s12 + $0x20] sm:$0xff] %v783_v54 }
 0x185   : > { %v827_v55 = vpop.f32.mrf.mxu3 }
 0x186   : > { %v828_v56 = vadd.f32 %v1621_v34, %v827_v55 }
 0x188   : > { %885 = vst [vmem:[%s1626_s12 + $0x98] sm:$0xff] %v828_v56 }
 0x189   : > { %v785_v57 = vpop.f32.mrf.mxu1 }
 0x18a   : > { %v786_v50 = vadd.f32 %v1621_v34, %v785_v57 }
 0x18c   : > { %871 = vst [vmem:[%s1626_s12 + $0x28] sm:$0xff] %v786_v50 }
 0x18d   : > { %v830_v59 = vpop.f32.mrf.mxu3 }
 0x18e   : > { %v831_v60 = vadd.f32 %v1621_v34, %v830_v59 }
 0x190   : > { %886 = vst [vmem:[%s1626_s12 + $0xa0] sm:$0xff] %v831_v60 }
 0x191   : > { %v788_v58 = vpop.f32.mrf.mxu1 }
 0x192   : > { %v789_v63 = vadd.f32 %v1621_v34, %v788_v58 }
 0x194   : > { %872 = vst [vmem:[%s1626_s12 + $0x30] sm:$0xff] %v789_v63 }
 0x195   : > { %v833_v1 = vpop.f32.mrf.mxu3 }
 0x196   : > { %v834_v2 = vadd.f32 %v1621_v34, %v833_v1 }
 0x198   : > { %887 = vst [vmem:[%s1626_s12 + $0xa8] sm:$0xff] %v834_v2 }
 0x199   : > { %v791_v61 = vpop.f32.mrf.mxu1 }
 0x19a   : > { %v792_v5 = vadd.f32 %v1621_v34, %v791_v61 }
 0x19c   : > { %873 = vst [vmem:[%s1626_s12 + $0x38] sm:$0xff] %v792_v5 }
 0x19d   : > { %v836_v3 = vpop.f32.mrf.mxu3 }
 0x19e   : > { %v837_v4 = vadd.f32 %v1621_v34, %v836_v3 }
 0x1a0   : > { %888 = vst [vmem:[%s1626_s12 + $0xb0] sm:$0xff] %v837_v4 }
 0x1a1   : > { %v794_v7 = vpop.f32.mrf.mxu1 }
 0x1a2   : > { %v795_v8 = vadd.f32 %v1621_v34, %v794_v7 }
 0x1a4   : > { %874 = vst [vmem:[%s1626_s12 + $0x40] sm:$0xff] %v795_v8 }
 0x1a5   : > { %v839_v9 = vpop.f32.mrf.mxu3 }
 0x1a6   : > { %v840_v62 = vadd.f32 %v1621_v34, %v839_v9 }
 0x1a8   : > { %889 = vst [vmem:[%s1626_s12 + $0xb8] sm:$0xff] %v840_v62 }
 0x1a9   : > { %v797_v11 = vpop.f32.mrf.mxu1 }
 0x1aa   : > { %v798_v6 = vadd.f32 %v1621_v34, %v797_v11 }
 0x1ac   : > { %875 = vst [vmem:[%s1626_s12 + $0x48] sm:$0xff] %v798_v6 }
 0x1ad   : > { %v842_v12 = vpop.f32.mrf.mxu3 }
 0x1ae   : > { %v843_v10 = vadd.f32 %v1621_v34, %v842_v12 }
 0x1b0   : > { %890 = vst [vmem:[%s1626_s12 + $0xc0] sm:$0xff] %v843_v10 }
 0x1b1   : > { %v800_v13 = vpop.f32.mrf.mxu1 }
 0x1b2   : > { %v801_v14 = vadd.f32 %v1621_v34, %v800_v13 }
 0x1b4   : > { %876 = vst [vmem:[%s1626_s12 + $0x50] sm:$0xff] %v801_v14 }
 0x1b5   : > { %v845_v15 = vpop.f32.mrf.mxu3 }
 0x1b6   : > { %v846_v16 = vadd.f32 %v1621_v34, %v845_v15 }
 0x1b8   : > { %891 = vst [vmem:[%s1626_s12 + $0xc8] sm:$0xff] %v846_v16 }
 0x1b9   : > { %v803_v19 = vpop.f32.mrf.mxu1 }
 0x1ba   : > { %v804_v18 = vadd.f32 %v1621_v34, %v803_v19 }
 0x1bc   : > { %877 = vst [vmem:[%s1626_s12 + $0x58] sm:$0xff] %v804_v18 }
 0x1bd   : > { %v848_v20 = vpop.f32.mrf.mxu3 }
 0x1be   : > { %v849_v17 = vadd.f32 %v1621_v34, %v848_v20 }
 0x1c0   : > { %892 = vst [vmem:[%s1626_s12 + $0xd0] sm:$0xff] %v849_v17 }
 0x1c1   : > { %v806_v23 = vpop.f32.mrf.mxu1 }
 0x1c2   : > { %v807_v21 = vadd.f32 %v1621_v34, %v806_v23 }
 0x1c4   : > { %878 = vst [vmem:[%s1626_s12 + $0x60] sm:$0xff] %v807_v21 }
 0x1c5   : > { %v851_v0 = vpop.f32.mrf.mxu3 }
 0x1c6   : > { %v852_v22 = vadd.f32 %v1621_v34, %v851_v0 }
 0x1c8   : > { %893 = vst [vmem:[%s1626_s12 + $0xd8] sm:$0xff] %v852_v22 }
 0x1c9   : > { %v809_v26 = vpop.f32.mrf.mxu1 }
 0x1ca   : > { %v810_v27 = vadd.f32 %v1621_v34, %v809_v26 }
 0x1cc   : > { %879 = vst [vmem:[%s1626_s12 + $0x68] sm:$0xff] %v810_v27 }
 0x1cd   : > { %v854_v24 = vpop.f32.mrf.mxu3 }
 0x1ce   : > { %v855_v30 = vadd.f32 %v1621_v34, %v854_v24 }
 0x1d0   : > { %894 = vst [vmem:[%s1626_s12 + $0xe0] sm:$0xff] %v855_v30 }
 0x1d1   : > { %v812_v25 = vpop.f32.mrf.mxu1 }
 0x1d2   : > { %v813_v28 = vadd.f32 %v1621_v34, %v812_v25 }
 0x1d4   : > { %880 = vst [vmem:[%s1626_s12 + $0x70] sm:$0xff] %v813_v28 }
 0x1d5   : > { %v857_v29 = vpop.f32.mrf.mxu3 }
 0x1d6   : > { %v858_v32 = vadd.f32 %v1621_v34, %v857_v29 }
 0x1d8   : > { %895 = vst [vmem:[%s1626_s12 + $0xe8] sm:$0xff] %v858_v32 }
 0x1d9   : > { %v815_v33 = vpop.f32.mrf.mxu1 }
 0x1da   : > { %v816_v31 = vadd.f32 %v1621_v34, %v815_v33 }
 0x1dc   : > { %881 = vst [vmem:[%s1626_s12 + $0x78] sm:$0xff] %v816_v31 }
 0x1dd   : > { %v860_v35 = vpop.f32.mrf.mxu3 }
 0x1de   : > { %v861_v37 = vadd.f32 %v1621_v34, %v860_v35 }
 0x1e0   : > { %896 = vst [vmem:[%s1626_s12 + $0xf0] sm:$0xff] %v861_v37 }
 0x1e5   : > { %v863_v38 = vpop.f32.mrf.mxu3 }
 0x1e6   : > { %v864_v39 = vadd.f32 %v1621_v34, %v863_v38 }
 0x1e8   : > { %897 = vst [vmem:[%s1626_s12 + $0xf8] sm:$0xff] %v864_v39 }
 0x1e9   : > { %1312 = shalt.err (!%p1309_p10)
}
 0x1ea   : > { %s1361_s8 = smov 128   ;;  %s1362_s9 = smov 8  }
 0x1eb   : > { %1068 = dma.vmem_to_hbm [thread:$0]  (%p1465_p3), %s912_s6, 4096, %s914_s7, %s899_s26, %s1361_s8, %s1361_s8, %s1362_s9  }
 0x1ec PF: > { %s928_s12 = sand.u32 1, %s1343_s18   ;;  %p1738_p12 = scmp.ge.s32.totalorder %s1355_s21, 2 }
 0x1ed   : > { %s929_s13 = scalar_lea.sflag [#allocation4], %s928_s12 }
 0x1ee   : > { %p1082_p13 = pnand %p1738_p12, %p1428_p6 }
 0x1f0   : > { %p1083_p0 = pneg %p1082_p13 }
 0x1f2   : > { %1338 = dma.done.wait (%p1083_p0), %s929_s13, 4096  }
 0x1f3   : > { %1340 = vsyncadd (%p1083_p0), %s929_s13, 4294963200  ;;  %p19_p5 = scmp.ge.s32.totalorder %s1455_s14, 4   ;;  %s1739_s18 = smov %s1347_s19 }
 0x1f4   : > { %s1740_s19 = smov %s1351_s20  ;;  %s1741_s20 = smov %s1471_s23 }
 0x1f5   : > { %s1742_s21 = smov %s1455_s14  ;;  %21 = sbr.rel (!%p19_p5) target bundleno = 6 (0x6), region = 93 }
 0x1fa   :  { %935 = vsyncpa [#allocation3], 1 }
 0x1fb   :  { %937 = vsyncpa [#allocation3 + $0x1], 1 }
 0x1fc   :  { %938 = vsyncpa [#allocation6], 1 }
 0x1fd   :  { %939 = vsyncpa [#allocation4], 1 }
 0x1fe   :  { %941 = vsyncpa [#allocation4 + $0x1], 1 }

</bundles_post_ra>
